<compile_context>
chip_gen: v7x
topology: tpu7x:2x2x1
jax: 0.10.0
libtpu: 0.0.40
codegen_flags: <defaults>
</compile_context>

<pallas_src>
import jax
import jax.numpy as jnp
from jax.experimental import pallas as pl
from jax.experimental.pallas import tpu as pltpu


def _layernorm_store(h, g_ref, beta_ref, o_ref, eps):
    # h is f32 [rows, H]; reduce over the full hidden dim (last axis).
    mean = jnp.mean(h, axis=-1, keepdims=True)
    centered = h - mean
    var = jnp.mean(centered * centered, axis=-1, keepdims=True)
    normed = centered * jax.lax.rsqrt(var + eps)
    o_ref[...] = (normed * g_ref[...] + beta_ref[...]).astype(o_ref.dtype)


def _make_kernel(eps, with_spatial):
    if with_spatial:
        def kernel(x_ref, w_ref, b_ref, inp_ref, sp_ref, g_ref, beta_ref, o_ref):
            # bf16 x / W on the MXU, f32 accumulation.
            h = jnp.dot(x_ref[...], w_ref[...], preferred_element_type=jnp.float32)
            h = h + b_ref[...]
            # Dropout: identity in eval mode.
            h = h + sp_ref[...].astype(jnp.float32) + inp_ref[...].astype(jnp.float32)
            _layernorm_store(h, g_ref, beta_ref, o_ref, eps)
        return kernel
    else:
        def kernel(x_ref, w_ref, b_ref, inp_ref, g_ref, beta_ref, o_ref):
            h = jnp.dot(x_ref[...], w_ref[...], preferred_element_type=jnp.float32)
            h = h + b_ref[...]
            h = h + inp_ref[...].astype(jnp.float32)
            _layernorm_store(h, g_ref, beta_ref, o_ref, eps)
        return kernel


def _estimate_vmem_bytes(row_block, I, H, x_dtype, w_dtype, res_dtype, out_dtype,
                         with_spatial):
    def nbytes(shape, dtype):
        n = 1
        for d in shape:
            n *= d
        return n * jnp.dtype(dtype).itemsize

    est = 0
    est += 2 * nbytes((row_block, I), x_dtype)        # activations, double-buffered
    est += 2 * nbytes((I, H), w_dtype)                # weight (constant block index; budget 2 bufs)
    est += 2 * nbytes((row_block, H), res_dtype)      # residual input
    if with_spatial:
        est += 2 * nbytes((row_block, H), res_dtype)  # spatial embeddings
    est += 2 * nbytes((row_block, H), out_dtype)      # output
    est += 6 * nbytes((1, H), jnp.float32)            # bias / gamma / beta
    est = int(est * 1.5)                              # headroom for compiler scratch
    # At least the default scoped limit, at most 64 MiB (v7x physical VMEM per TC).
    return max(32 << 20, min(est, 64 << 20))


def layoutlmv2_output(hidden_states, input_tensor, params,
                      spatial_position_embeddings=None,
                      eps=1e-12, row_block=256,
                      compute_dtype=jnp.bfloat16,
                      vmem_limit_bytes=None):
    """hidden_states: [B, S, I]; input_tensor: [B, S, H]; optional spatial: [B, S, H]."""
    B, S, I = hidden_states.shape
    H = input_tensor.shape[-1]
    M = B * S
    out_dtype = hidden_states.dtype
    with_spatial = spatial_position_embeddings is not None

    x = hidden_states.reshape(M, I)
    inp = input_tensor.reshape(M, H)
    sp = spatial_position_embeddings.reshape(M, H) if with_spatial else None

    # bf16 MXU operands (f32 accumulation happens in the kernel).
    if compute_dtype is not None:
        x = x.astype(compute_dtype)
        w = params["w"].astype(compute_dtype)
    else:
        w = params["w"]
    b = params["b"].reshape(1, H).astype(jnp.float32)
    gamma = params["gamma"].reshape(1, H).astype(jnp.float32)
    beta = params["beta"].reshape(1, H).astype(jnp.float32)

    # Pad token rows to a multiple of row_block (padded rows are sliced off after).
    m_pad = row_block * pl.cdiv(M, row_block)
    pad = m_pad - M
    if pad:
        x = jnp.pad(x, ((0, pad), (0, 0)))
        inp = jnp.pad(inp, ((0, pad), (0, 0)))
        if with_spatial:
            sp = jnp.pad(sp, ((0, pad), (0, 0)))

    grid = (m_pad // row_block,)

    in_specs = [
        pl.BlockSpec((row_block, I), lambda i: (i, 0)),   # activation rows
        pl.BlockSpec((I, H), lambda i: (0, 0)),           # full weight (constant block index)
        pl.BlockSpec((1, H), lambda i: (0, 0)),           # bias
        pl.BlockSpec((row_block, H), lambda i: (i, 0)),   # residual input rows
    ]
    args = [x, w, b, inp]
    if with_spatial:
        in_specs.append(pl.BlockSpec((row_block, H), lambda i: (i, 0)))  # spatial rows
        args.append(sp)
    in_specs += [
        pl.BlockSpec((1, H), lambda i: (0, 0)),           # gamma
        pl.BlockSpec((1, H), lambda i: (0, 0)),           # beta
    ]
    args += [gamma, beta]

    if vmem_limit_bytes is None:
        vmem_limit_bytes = _estimate_vmem_bytes(
            row_block, I, H, x.dtype, w.dtype, inp.dtype, out_dtype, with_spatial)

    out = pl.pallas_call(
        _make_kernel(eps, with_spatial),
        out_shape=jax.ShapeDtypeStruct((m_pad, H), out_dtype),
        grid_spec=pltpu.PrefetchScalarGridSpec(
            num_scalar_prefetch=0,
            grid=grid,
            in_specs=in_specs,
            out_specs=pl.BlockSpec((row_block, H), lambda i: (i, 0)),
        ),
        compiler_params=pltpu.CompilerParams(
            dimension_semantics=("parallel",),
            vmem_limit_bytes=vmem_limit_bytes),
    )(*args)

    return out[:M].reshape(B, S, H)


def init_params(key, intermediate_size, hidden_size, dtype=jnp.float32):
    kw, kb = jax.random.split(key)
    # nn.Linear default: U(-1/sqrt(fan_in), 1/sqrt(fan_in)); deterministic synthetic init.
    bound = 1.0 / (intermediate_size ** 0.5)
    w = jax.random.uniform(kw, (intermediate_size, hidden_size), dtype,
                           minval=-bound, maxval=bound)
    b = jax.random.uniform(kb, (hidden_size,), dtype, minval=-bound, maxval=bound)
    gamma = jnp.ones((hidden_size,), dtype)
    beta = jnp.zeros((hidden_size,), dtype)
    return {"w": w, "b": b, "gamma": gamma, "beta": beta}


if __name__ == "__main__":
    # Small smoke-test shapes (real LayoutLMv2: H=768, I=3072, M=1024-4096).
    B, S = 2, 8
    hidden_size = 32
    intermediate_size = 64

    key = jax.random.PRNGKey(0)
    k1, k2, k3, kp = jax.random.split(key, 4)

    hidden_states = jax.random.normal(k1, (B, S, intermediate_size), jnp.float32)
    input_tensor = jax.random.normal(k2, (B, S, hidden_size), jnp.float32)
    spatial = jax.random.normal(k3, (B, S, hidden_size), jnp.float32)

    params = init_params(kp, intermediate_size, hidden_size)

    out = layoutlmv2_output(hidden_states, input_tensor, params,
                            spatial_position_embeddings=spatial)
    out = jax.block_until_ready(out)

    # Also exercise the no-spatial kernel variant.
    out_ns = layoutlmv2_output(hidden_states, input_tensor, params)
    out_ns = jax.block_until_ready(out_ns)

    # Pure-JAX reference with the same bf16 matmul inputs + f32 LayerNorm.
    def ref_fn(sp_arr):
        xb = hidden_states.reshape(-1, intermediate_size).astype(jnp.bfloat16)
        wb = params["w"].astype(jnp.bfloat16)
        h = jnp.dot(xb, wb, preferred_element_type=jnp.float32) + params["b"]
        if sp_arr is not None:
            h = h + sp_arr.reshape(-1, hidden_size)
        h = h + input_tensor.reshape(-1, hidden_size)
        mean = h.mean(-1, keepdims=True)
        var = ((h - mean) ** 2).mean(-1, keepdims=True)
        r = ((h - mean) * jax.lax.rsqrt(var + 1e-12)) * params["gamma"] + params["beta"]
        return r.reshape(B, S, hidden_size)

    ref = ref_fn(spatial)
    ref_ns = ref_fn(None)
    assert jnp.allclose(out, ref, atol=2e-3, rtol=2e-3), "mismatch vs reference (spatial)"
    assert jnp.allclose(out_ns, ref_ns, atol=2e-3, rtol=2e-3), "mismatch vs reference (no spatial)"

    print("KERNEL_OK")
</pallas_src>

<mosaic_0001>
module attributes {stable_mosaic.version = 11 : i64} {
  func.func @kernel(%arg0: i32, %arg1: memref<256x64xbf16, #tpu.memory_space<vmem>>, %arg2: memref<64x32xbf16, #tpu.memory_space<vmem>>, %arg3: memref<1x32xf32, #tpu.memory_space<vmem>>, %arg4: memref<256x32xf32, #tpu.memory_space<vmem>>, %arg5: memref<256x32xf32, #tpu.memory_space<vmem>>, %arg6: memref<1x32xf32, #tpu.memory_space<vmem>>, %arg7: memref<1x32xf32, #tpu.memory_space<vmem>>, %arg8: memref<256x32xf32, #tpu.memory_space<vmem>>) attributes {dimension_semantics = [#tpu.dimension_semantics<parallel>], iteration_bounds = array<i64: 1>, scalar_prefetch = 0 : i64, scratch_operands = 0 : i64, tpu.core_type = #tpu.core_type<tc>, window_params = [{transform_indices = @transform_0, window_bounds = array<i64: 256, 64>}, {pipeline_mode = #tpu.pipeline_mode<synchronous>, transform_indices = @transform_1, window_bounds = array<i64: 64, 32>}, {pipeline_mode = #tpu.pipeline_mode<synchronous>, transform_indices = @transform_2, window_bounds = array<i64: 1, 32>}, {transform_indices = @transform_3, window_bounds = array<i64: 256, 32>}, {transform_indices = @transform_4, window_bounds = array<i64: 256, 32>}, {pipeline_mode = #tpu.pipeline_mode<synchronous>, transform_indices = @transform_5, window_bounds = array<i64: 1, 32>}, {pipeline_mode = #tpu.pipeline_mode<synchronous>, transform_indices = @transform_6, window_bounds = array<i64: 1, 32>}, {transform_indices = @transform_7, window_bounds = array<i64: 256, 32>}]} {
    %c0 = arith.constant 0 : index
    %c0_0 = arith.constant 0 : index
    %0 = vector.load %arg1[%c0, %c0_0] : memref<256x64xbf16, #tpu.memory_space<vmem>>, vector<256x64xbf16>
    %c0_1 = arith.constant 0 : index
    %c0_2 = arith.constant 0 : index
    %1 = vector.load %arg2[%c0_1, %c0_2] : memref<64x32xbf16, #tpu.memory_space<vmem>>, vector<64x32xbf16>
    %cst = arith.constant dense<0.000000e+00> : vector<256x32xf32>
    %2 = tpu.matmul %0, %1, %cst {dimension_numbers = #tpu.dot_dimension_numbers<[1], [0], [0], [1], [0, 0, 1, 1], [], []>} : vector<256x64xbf16>, vector<64x32xbf16>, vector<256x32xf32> -> vector<256x32xf32>
    %c0_3 = arith.constant 0 : index
    %c0_4 = arith.constant 0 : index
    %3 = vector.load %arg3[%c0_3, %c0_4] : memref<1x32xf32, #tpu.memory_space<vmem>>, vector<1x32xf32>
    %4 = vector.broadcast %3 : vector<1x32xf32> to vector<256x32xf32>
    %5 = arith.addf %2, %4 : vector<256x32xf32>
    %c0_5 = arith.constant 0 : index
    %c0_6 = arith.constant 0 : index
    %6 = vector.load %arg5[%c0_5, %c0_6] : memref<256x32xf32, #tpu.memory_space<vmem>>, vector<256x32xf32>
    %7 = arith.addf %5, %6 : vector<256x32xf32>
    %c0_7 = arith.constant 0 : index
    %c0_8 = arith.constant 0 : index
    %8 = vector.load %arg4[%c0_7, %c0_8] : memref<256x32xf32, #tpu.memory_space<vmem>>, vector<256x32xf32>
    %9 = arith.addf %7, %8 : vector<256x32xf32>
    %cst_9 = arith.constant dense<0.000000e+00> : vector<256xf32>
    %10 = vector.multi_reduction <add>, %9, %cst_9 [1] : vector<256x32xf32> to vector<256xf32>
    %11 = vector.shape_cast %10 : vector<256xf32> to vector<256x1xf32>
    %cst_10 = arith.constant 3.200000e+01 : f32
    %12 = vector.broadcast %cst_10 : f32 to vector<256x1xf32>
    %13 = arith.divf %11, %12 : vector<256x1xf32>
    %14 = vector.broadcast %13 : vector<256x1xf32> to vector<256x32xf32>
    %15 = arith.subf %9, %14 : vector<256x32xf32>
    %16 = arith.mulf %15, %15 : vector<256x32xf32>
    %cst_11 = arith.constant dense<0.000000e+00> : vector<256xf32>
    %17 = vector.multi_reduction <add>, %16, %cst_11 [1] : vector<256x32xf32> to vector<256xf32>
    %18 = vector.shape_cast %17 : vector<256xf32> to vector<256x1xf32>
    %cst_12 = arith.constant 3.200000e+01 : f32
    %19 = vector.broadcast %cst_12 : f32 to vector<256x1xf32>
    %20 = arith.divf %18, %19 : vector<256x1xf32>
    %cst_13 = arith.constant 9.99999996E-13 : f32
    %21 = vector.broadcast %cst_13 : f32 to vector<256x1xf32>
    %22 = arith.addf %20, %21 : vector<256x1xf32>
    %23 = math.rsqrt %22 : vector<256x1xf32>
    %24 = vector.broadcast %23 : vector<256x1xf32> to vector<256x32xf32>
    %25 = arith.mulf %15, %24 : vector<256x32xf32>
    %c0_14 = arith.constant 0 : index
    %c0_15 = arith.constant 0 : index
    %26 = vector.load %arg6[%c0_14, %c0_15] : memref<1x32xf32, #tpu.memory_space<vmem>>, vector<1x32xf32>
    %27 = vector.broadcast %26 : vector<1x32xf32> to vector<256x32xf32>
    %28 = arith.mulf %25, %27 : vector<256x32xf32>
    %c0_16 = arith.constant 0 : index
    %c0_17 = arith.constant 0 : index
    %29 = vector.load %arg7[%c0_16, %c0_17] : memref<1x32xf32, #tpu.memory_space<vmem>>, vector<1x32xf32>
    %30 = vector.broadcast %29 : vector<1x32xf32> to vector<256x32xf32>
    %31 = arith.addf %28, %30 : vector<256x32xf32>
    %c0_18 = arith.constant 0 : index
    %c0_19 = arith.constant 0 : index
    %32 = vector.load %arg8[%c0_18, %c0_19] : memref<256x32xf32, #tpu.memory_space<vmem>>, vector<256x32xf32>
    tpu.vector_store %arg8[%c0_18, %c0_19], %31 {strides = array<i32>} : memref<256x32xf32, #tpu.memory_space<vmem>>, vector<256x32xf32>,
    return
  }
  func.func @transform_0(%arg0: i32) -> (i32, i32) {
    %c0_i32 = arith.constant 0 : i32
    %c0_i32_0 = arith.constant 0 : i32
    return %arg0, %c0_i32 : i32, i32
  }
  func.func @transform_1(%arg0: i32) -> (i32, i32) {
    %c0_i32 = arith.constant 0 : i32
    %c0_i32_0 = arith.constant 0 : i32
    %c0_i32_1 = arith.constant 0 : i32
    return %c0_i32, %c0_i32_0 : i32, i32
  }
  func.func @transform_2(%arg0: i32) -> (i32, i32) {
    %c0_i32 = arith.constant 0 : i32
    %c0_i32_0 = arith.constant 0 : i32
    %c0_i32_1 = arith.constant 0 : i32
    return %c0_i32, %c0_i32_0 : i32, i32
  }
  func.func @transform_3(%arg0: i32) -> (i32, i32) {
    %c0_i32 = arith.constant 0 : i32
    %c0_i32_0 = arith.constant 0 : i32
    return %arg0, %c0_i32 : i32, i32
  }
  func.func @transform_4(%arg0: i32) -> (i32, i32) {
    %c0_i32 = arith.constant 0 : i32
    %c0_i32_0 = arith.constant 0 : i32
    return %arg0, %c0_i32 : i32, i32
  }
  func.func @transform_5(%arg0: i32) -> (i32, i32) {
    %c0_i32 = arith.constant 0 : i32
    %c0_i32_0 = arith.constant 0 : i32
    %c0_i32_1 = arith.constant 0 : i32
    return %c0_i32, %c0_i32_0 : i32, i32
  }
  func.func @transform_6(%arg0: i32) -> (i32, i32) {
    %c0_i32 = arith.constant 0 : i32
    %c0_i32_0 = arith.constant 0 : i32
    %c0_i32_1 = arith.constant 0 : i32
    return %c0_i32, %c0_i32_0 : i32, i32
  }
  func.func @transform_7(%arg0: i32) -> (i32, i32) {
    %c0_i32 = arith.constant 0 : i32
    %c0_i32_0 = arith.constant 0 : i32
    return %arg0, %c0_i32 : i32, i32
  }
}

</mosaic_0001>

<bundles_post_ra>
// kernel: tpu_custom_call.1
= control target key start
LH: loop header
LB: loop body
LE: loop exit
PB: predicated region body
PF: predicated region fallthrough
CT: control target
= control target key end

     0   :  { %vm178_vm0 = vcmask 523264   ;;  %vm516_vm1 = vcmask 261120   ;;  %s2171_s1 = inlined_call_operand.vmem [shape: bf16[64,32], index: 1, kind: input, shape index: {}]   ;;  %s2172_s0 = inlined_call_operand.vmem [shape: bf16[256,64], index: 0, kind: input, shape index: {}]   ;;  %s2173_s2 = inlined_call_operand.vmem [shape: f32[1,32], index: 2, kind: input, shape index: {}]   ;;  %s2174_s4 = inlined_call_operand.vmem [shape: f32[256,32], index: 4, kind: input, shape index: {}]   ;;  %s2175_s3 = inlined_call_operand.vmem [shape: f32[256,32], index: 3, kind: input, shape index: {}]   ;;  %s2176_s5 = inlined_call_operand.vmem [shape: f32[1,32], index: 5, kind: input, shape index: {}]   ;;  %s2177_s6 = inlined_call_operand.vmem [shape: f32[1,32], index: 6, kind: input, shape index: {}]   ;;  %s2178_s7 = inlined_call_operand.vmem [shape: f32[256,32], index: 7, kind: output, shape index: {}]  }
   0x1   :  { %v1155_v0 = vld [vmem:[%s2171_s1] sm:$0xff]   ;;  %v1156_v1 = vld [vmem:[%s2171_s1 + $0x8] sm:$0xff]   ;;  %v1157_v2 = vld [vmem:[%s2171_s1 + $0x10] sm:$0xff]  }
   0x2   :  { %1107 = vmatprep.subr.bf16.mxu0 %v1155_v0  ;;  %1147 = vmatprep.subr.bf16.mxu1 %v1155_v0  ;;  %v1159_v3 = vld [vmem:[%s2172_s0] sm:$0xff]   ;;  %v1158_v5 = vld [vmem:[%s2171_s1 + $0x18] sm:$0xff]   ;;  %v1161_v6 = vld [vmem:[%s2172_s0 + $0x8] sm:$0xff]  }
   0x3   :  { %1108 = vmatpush3.bf16.msra.mxu0 %v1155_v0  ;;  %1151 = vmatpush3.bf16.msra.mxu1 %v1155_v0  ;;  %v1160_v4 = vld [vmem:[%s2172_s0 + $0x40] sm:$0xff]   ;;  %v1162_v7 = vld [vmem:[%s2172_s0 + $0x48] sm:$0xff]   ;;  %v1163_v8 = vld [vmem:[%s2172_s0 + $0x10] sm:$0xff]  }
   0x4   :  { %1109 = vmatprep.subr.bf16.mxu0 %v1156_v1  ;;  %1148 = vmatprep.subr.bf16.mxu1 %v1156_v1  ;;  %v1165_v9 = vld [vmem:[%s2172_s0 + $0x50] sm:$0xff]   ;;  %v1164_v10 = vld [vmem:[%s2172_s0 + $0x18] sm:$0xff]   ;;  %v1167_v12 = vld [vmem:[%s2172_s0 + $0x20] sm:$0xff]  }
   0x5   :  { %1115 = vmatprep.mubr.msk.bf16.mxu0 %vm178_vm0, %v1159_v3  ;;  %1131 = vmatprep.mubr.msk.bf16.mxu1 %vm178_vm0, %v1160_v4  ;;  %v1166_v11 = vld [vmem:[%s2172_s0 + $0x58] sm:$0xff]   ;;  %v1169_v13 = vld [vmem:[%s2172_s0 + $0x60] sm:$0xff]   ;;  %v1168_v14 = vld [vmem:[%s2172_s0 + $0x28] sm:$0xff]  }
   0x6   :  { %v1170_v15 = vld [vmem:[%s2172_s0 + $0x68] sm:$0xff]   ;;  %v1171_v16 = vld [vmem:[%s2172_s0 + $0x30] sm:$0xff]   ;;  %v1172_v18 = vld [vmem:[%s2172_s0 + $0x38] sm:$0xff]  }
   0x7   :  { %1110 = vmatpush3.bf16.msra.mxu0 %v1156_v1  ;;  %1152 = vmatpush3.bf16.msra.mxu1 %v1156_v1  ;;  %v1173_v17 = vld [vmem:[%s2172_s0 + $0x70] sm:$0xff]   ;;  %v1174_v19 = vld [vmem:[%s2172_s0 + $0x78] sm:$0xff]   ;;  %v1358_v20 = vld [vmem:[%s2173_s2] ss:$0 sm:$0xff] }
   0x8   :  { %1111 = vmatprep.subr.bf16.mxu0 %v1157_v2  ;;  %1149 = vmatprep.subr.bf16.mxu1 %v1157_v2  ;;  %v390_v22 = vld [vmem:[%s2174_s4 + $0x10] sm:$0xff]  ;;  %v388_v28 = vld [vmem:[%s2174_s4] sm:$0xff]  ;;  %v391_v33 = vld [vmem:[%s2174_s4 + $0x18] sm:$0xff] }
   0x9   :  { %v406_v24 = vld [vmem:[%s2174_s4 + $0x90] sm:$0xff]  ;;  %v404_v39 = vld [vmem:[%s2174_s4 + $0x80] sm:$0xff]  ;;  %v407_v42 = vld [vmem:[%s2174_s4 + $0x98] sm:$0xff] }
   0xa   :  { %v470_v35 = vld [vmem:[%s2175_s3 + $0x90] sm:$0xff]  ;;  %v455_v46 = vld [vmem:[%s2175_s3 + $0x18] sm:$0xff]  ;;  %v452_v47 = vld [vmem:[%s2175_s3] sm:$0xff] }
   0xb   :  { %1112 = vmatpush3.bf16.msra.mxu0 %v1157_v2  ;;  %1153 = vmatpush3.bf16.msra.mxu1 %v1157_v2  ;;  %v454_v36 = vld [vmem:[%s2175_s3 + $0x10] sm:$0xff]  ;;  %v389_v55 = vld [vmem:[%s2174_s4 + $0x8] sm:$0xff]  ;;  %v468_v61 = vld [vmem:[%s2175_s3 + $0x80] sm:$0xff] }
   0xc   :  { %1113 = vmatprep.subr.bf16.mxu0 %v1158_v5  ;;  %1150 = vmatprep.subr.bf16.mxu1 %v1158_v5  ;;  %v405_v56 = vld [vmem:[%s2174_s4 + $0x88] sm:$0xff]  ;;  %v471_v63 = vld [vmem:[%s2175_s3 + $0x98] sm:$0xff] }
   0xf   :  { %1114 = vmatpush3.bf16.msra.mxu0 %v1158_v5  ;;  %1154 = vmatpush3.bf16.msra.mxu1 %v1158_v5 }
  0x12   :  { %1116 = vmatmul.mubr.msk.bf16.vlgmr.msra.gmra.mrb[0].mxu0 %vm178_vm0, %v1161_v6  ;;  %1132 = vmatmul.mubr.msk.bf16.vlgmr.msra.gmra.mrb[0].mxu1 %vm178_vm0, %v1162_v7  ;;  %v394_v6 = vld [vmem:[%s2174_s4 + $0x30] sm:$0xff] }
  0x13   :  { %1119 = vmatprep.mubr.msk.bf16.mxu0 %vm178_vm0, %v1163_v8  ;;  %1135 = vmatprep.mubr.msk.bf16.mxu1 %vm178_vm0, %v1165_v9  ;;  %v395_v8 = vld [vmem:[%s2174_s4 + $0x38] sm:$0xff] }
  0x1a   :  { %1120 = vmatmul.mubr.msk.bf16.gmra.mrb[4].mxu0 %vm178_vm0, %v1164_v10  ;;  %1136 = vmatmul.mubr.msk.bf16.gmra.mrb[4].mxu1 %vm178_vm0, %v1166_v11 }
  0x1b   :  { %1123 = vmatprep.mubr.msk.bf16.mxu0 %vm178_vm0, %v1167_v12  ;;  %1139 = vmatprep.mubr.msk.bf16.mxu1 %vm178_vm0, %v1169_v13 }
  0x22   :  { %1124 = vmatmul.mubr.msk.bf16.gmra.mrb[8].mxu0 %vm178_vm0, %v1168_v14  ;;  %1140 = vmatmul.mubr.msk.bf16.gmra.mrb[8].mxu1 %vm178_vm0, %v1170_v15 }
  0x23   :  { %1127 = vmatprep.mubr.msk.bf16.mxu0 %vm178_vm0, %v1171_v16  ;;  %1143 = vmatprep.mubr.msk.bf16.mxu1 %vm178_vm0, %v1173_v17  ;;  %v469_v17 = vld [vmem:[%s2175_s3 + $0x88] sm:$0xff] }
  0x2a   :  { %1128 = vmatmul.mubr.msk.bf16.gmra.mrb[12].mxu0 %vm178_vm0, %v1172_v18  ;;  %1144 = vmatmul.mubr.msk.bf16.gmra.mrb[12].mxu1 %vm178_vm0, %v1174_v19  ;;  %v453_v18 = vld [vmem:[%s2175_s3 + $0x8] sm:$0xff] }
  0xe5   :  { %v1117_v21 = vpop.f32.mrb[0].mxu0  ;;  %v1133_v23 = vpop.f32.mrb[0].mxu1 }
  0xe6   :  { %v270_v25 = vadd.f32 %v1117_v21, %v1358_v20  ;;  %v334_v26 = vadd.f32 %v1133_v23, %v1358_v20  ;;  %v261_v27 = vpop.f32.mrb[1].mxu0  ;;  %v325_v29 = vpop.f32.mrb[1].mxu1  ;;  %v410_v23 = vld [vmem:[%s2174_s4 + $0xb0] sm:$0xff] }
  0xe7   :  { %v262_v30 = vadd.f32 %v1358_v20, %v261_v27  ;;  %v326_v31 = vadd.f32 %v1358_v20, %v325_v29  ;;  %v1118_v32 = vpop.f32.mrb[2].mxu0  ;;  %v1134_v34 = vpop.f32.mrb[2].mxu1  ;;  %v458_v27 = vld [vmem:[%s2175_s3 + $0x30] sm:$0xff] }
  0xe8   :  { %v422_v37 = vadd.f32 %v390_v22, %v270_v25  ;;  %v438_v38 = vadd.f32 %v406_v24, %v334_v26  ;;  %v273_v40 = vadd.f32 %v1118_v32, %v1358_v20  ;;  %v337_v41 = vadd.f32 %v1134_v34, %v1358_v20  ;;  %v264_v43 = vpop.f32.mrb[3].mxu0  ;;  %v328_v44 = vpop.f32.mrb[3].mxu1  ;;  %v411_v25 = vld [vmem:[%s2174_s4 + $0xb8] sm:$0xff] }
  0xe9   :  { %v420_v45 = vadd.f32 %v388_v28, %v262_v30  ;;  %v436_v51 = vadd.f32 %v404_v39, %v326_v31  ;;  %v265_v53 = vadd.f32 %v1358_v20, %v264_v43  ;;  %v329_v54 = vadd.f32 %v1358_v20, %v328_v44  ;;  %v459_v26 = vld [vmem:[%s2175_s3 + $0x38] sm:$0xff] }
  0xea   :  { %v423_v48 = vadd.f32 %v391_v33, %v273_v40  ;;  %v1396_v49 = vadd.f32 %v470_v35, %v438_v38  ;;  %v1398_v50 = vadd.f32 %v454_v36, %v422_v37  ;;  %v439_v52 = vadd.f32 %v407_v42, %v337_v41  ;;  %v475_v40 = vld [vmem:[%s2175_s3 + $0xb8] sm:$0xff]  ;;  %v474_v41 = vld [vmem:[%s2175_s3 + $0xb0] sm:$0xff] }
  0xeb   :  { %v1414_v60 = vadd.f32 %v452_v47, %v420_v45  ;;  %v421_v4 = vadd.f32 %v389_v55, %v265_v53  ;;  %v437_v5 = vadd.f32 %v405_v56, %v329_v54  ;;  %v1429_v9 = vadd.f32 %v468_v61, %v436_v51  ;;  %v393_v53 = vld [vmem:[%s2174_s4 + $0x28] sm:$0xff] }
  0xec   :  { %v571_v57 = vsel %vm516_vm1, %v1396_v49, 0.0  ;;  %v523_v58 = vsel %vm516_vm1, %v1398_v50, 0.0  ;;  %v1412_v59 = vadd.f32 %v455_v46, %v423_v48  ;;  %v1435_v13 = vadd.f32 %v471_v63, %v439_v52  ;;  %v392_v52 = vld [vmem:[%s2174_s4 + $0x20] sm:$0xff] }
  0xed   :  { %572 = vadd.xlane.f32.xlu0 %v571_v57  ;;  %524 = vadd.xlane.f32.xlu1 %v523_v58  ;;  %v1121_v62 = vpop.f32.mrb[4].mxu0  ;;  %v1137_v0 = vpop.f32.mrb[4].mxu1  ;;  %v517_v12 = vsel %vm516_vm1, %v1414_v60, 0.0  ;;  %v565_v29 = vsel %vm516_vm1, %v1429_v9, 0.0  ;;  %v1462_v30 = vadd.f32 %v469_v17, %v437_v5  ;;  %v1464_v31 = vadd.f32 %v453_v18, %v421_v4  ;;  %v408_v63 = vld [vmem:[%s2174_s4 + $0xa0] sm:$0xff] }
  0xee   :  { %v286_v1 = vadd.f32 %v1121_v62, %v1358_v20  ;;  %v277_v2 = vpop.f32.mrb[5].mxu0  ;;  %v341_v3 = vpop.f32.mrb[5].mxu1  ;;  %v526_v11 = vsel %vm516_vm1, %v1412_v59, 0.0  ;;  %v350_v22 = vadd.f32 %v1137_v0, %v1358_v20  ;;  %v574_v28 = vsel %vm516_vm1, %v1435_v13, 0.0 }
  0xef   :  { %v1122_v7 = vpop.f32.mrb[6].mxu0  ;;  %v1138_v10 = vpop.f32.mrb[6].mxu1  ;;  %v278_v44 = vadd.f32 %v1358_v20, %v277_v2  ;;  %v568_v46 = vsel %vm516_vm1, %v1462_v30, 0.0  ;;  %v520_v47 = vsel %vm516_vm1, %v1464_v31, 0.0  ;;  %v342_v62 = vadd.f32 %v1358_v20, %v341_v3  ;;  %v457_v2 = vld [vmem:[%s2175_s3 + $0x28] sm:$0xff]  ;;  %v456_v3 = vld [vmem:[%s2175_s3 + $0x20] sm:$0xff] }
  0xf0   :  { %v289_v14 = vadd.f32 %v1122_v7, %v1358_v20  ;;  %v280_v15 = vpop.f32.mrb[7].mxu0  ;;  %v344_v16 = vpop.f32.mrb[7].mxu1  ;;  %v426_v19 = vadd.f32 %v394_v6, %v286_v1  ;;  %v353_v24 = vadd.f32 %v1138_v10, %v1358_v20  ;;  %v442_v34 = vadd.f32 %v410_v23, %v350_v22  ;;  %v409_v1 = vld [vmem:[%s2174_s4 + $0xa8] sm:$0xff] }
  0xf1   :  { %527 = vadd.xlane.f32.xlu1 %v526_v11  ;;  %518 = vadd.xlane.f32.xlu0 %v517_v12  ;;  %v281_v45 = vadd.f32 %v1358_v20, %v280_v15  ;;  %v424_v58 = vadd.f32 %v392_v52, %v278_v44  ;;  %v345_v0 = vadd.f32 %v1358_v20, %v344_v16  ;;  %v399_v15 = vld [vmem:[%s2174_s4 + $0x58] sm:$0xff] }
  0xf2   :  { %v427_v21 = vadd.f32 %v395_v8, %v289_v14  ;;  %v443_v35 = vadd.f32 %v411_v25, %v353_v24  ;;  %v1468_v37 = vadd.f32 %v458_v27, %v426_v19  ;;  %v1502_v57 = vadd.f32 %v474_v41, %v442_v34  ;;  %v398_v14 = vld [vmem:[%s2174_s4 + $0x50] sm:$0xff]  ;;  %v473_v25 = vld [vmem:[%s2175_s3 + $0xa8] sm:$0xff] }
  0xf3   :  { %v425_v61 = vadd.f32 %v393_v53, %v281_v45  ;;  %v440_v18 = vadd.f32 %v408_v63, %v342_v62  ;;  %v441_v19 = vadd.f32 %v409_v1, %v345_v0  ;;  %v1542_v22 = vadd.f32 %v456_v3, %v424_v58  ;;  %v462_v41 = vld [vmem:[%s2175_s3 + $0x50] sm:$0xff]  ;;  %v396_v58 = vld [vmem:[%s2174_s4 + $0x40] sm:$0xff]  ;;  %v397_v63 = vld [vmem:[%s2174_s4 + $0x48] sm:$0xff] }
  0xf4   :  { %v1466_v36 = vadd.f32 %v459_v26, %v427_v21  ;;  %v535_v55 = vsel %vm516_vm1, %v1468_v37, 0.0  ;;  %v1500_v56 = vadd.f32 %v475_v40, %v443_v35  ;;  %v583_v7 = vsel %vm516_vm1, %v1502_v57, 0.0  ;;  %v472_v26 = vld [vmem:[%s2175_s3 + $0xa0] sm:$0xff]  ;;  %v415_v35 = vld [vmem:[%s2174_s4 + $0xd8] sm:$0xff] }
  0xf5   :  { %575 = vadd.xlane.f32.xlu1 %v574_v28  ;;  %566 = vadd.xlane.f32.xlu0 %v565_v29  ;;  %v1125_v32 = vpop.f32.mrb[8].mxu0  ;;  %v1141_v33 = vpop.f32.mrb[8].mxu1  ;;  %v1540_v21 = vadd.f32 %v457_v2, %v425_v61  ;;  %v463_v40 = vld [vmem:[%s2175_s3 + $0x58] sm:$0xff]  ;;  %v1572_v44 = vadd.f32 %v473_v25, %v441_v19 }
  0xf6   :  { %v1470_v38 = vpop.f32.mrb[9].mxu0  ;;  %v1472_v39 = vpop.f32.mrb[9].mxu1  ;;  %v538_v54 = vsel %vm516_vm1, %v1466_v36, 0.0  ;;  %v586_v6 = vsel %vm516_vm1, %v1500_v56, 0.0  ;;  %v302_v8 = vadd.f32 %v1125_v32, %v1358_v20  ;;  %v366_v29 = vadd.f32 %v1141_v33, %v1358_v20  ;;  %v414_v32 = vld [vmem:[%s2174_s4 + $0xd0] sm:$0xff] }
  0xf7   :  { %v1126_v42 = vpop.f32.mrb[10].mxu0  ;;  %v1142_v43 = vpop.f32.mrb[10].mxu1  ;;  %v532_v33 = vsel %vm516_vm1, %v1540_v21, 0.0  ;;  %v294_v53 = vadd.f32 %v1358_v20, %v1470_v38  ;;  %v580_v62 = vsel %vm516_vm1, %v1572_v44, 0.0 }
  0xf8   :  { %v1486_v48 = vpop.f32.mrb[11].mxu0  ;;  %v1488_v51 = vpop.f32.mrb[11].mxu1  ;;  %v305_v10 = vadd.f32 %v1126_v42, %v1358_v20  ;;  %v430_v27 = vadd.f32 %v398_v14, %v302_v8  ;;  %v369_v34 = vadd.f32 %v1142_v43, %v1358_v20  ;;  %v529_v42 = vsel %vm516_vm1, %v1542_v22, 0.0  ;;  %v412_v8 = vld [vmem:[%s2174_s4 + $0xc0] sm:$0xff] }
  0xf9   :  { %569 = vadd.xlane.f32.xlu1 %v568_v46  ;;  %521 = vadd.xlane.f32.xlu0 %v520_v47  ;;  %v1574_v43 = vadd.f32 %v472_v26, %v440_v18  ;;  %v446_v45 = vadd.f32 %v414_v32, %v366_v29  ;;  %v297_v61 = vadd.f32 %v1358_v20, %v1486_v48  ;;  %v460_v14 = vld [vmem:[%s2175_s3 + $0x40] sm:$0xff] }
  0xfa   :  { %v431_v28 = vadd.f32 %v399_v15, %v305_v10  ;;  %v447_v46 = vadd.f32 %v415_v35, %v369_v34  ;;  %v1578_v52 = vadd.f32 %v462_v41, %v430_v27  ;;  %v428_v3 = vadd.f32 %v396_v58, %v294_v53  ;;  %v413_v15 = vld [vmem:[%s2174_s4 + $0xc8] sm:$0xff]  ;;  %v402_v27 = vld [vmem:[%s2174_s4 + $0x70] sm:$0xff]  ;;  %v400_v58 = vld [vmem:[%s2174_s4 + $0x60] sm:$0xff] }
  0xfb   :  { %v577_v38 = vsel %vm516_vm1, %v1574_v43, 0.0  ;;  %v361_v10 = vadd.f32 %v1358_v20, %v1488_v51 }
  0xfc   :  { %v1576_v47 = vadd.f32 %v463_v40, %v431_v28  ;;  %v547_v1 = vsel %vm516_vm1, %v1578_v52, 0.0  ;;  %v403_v28 = vld [vmem:[%s2174_s4 + $0x78] sm:$0xff]  ;;  %v1637_v29 = vadd.f32 %v460_v14, %v428_v3 }
  0xfd   :  { %539 = vadd.xlane.f32.xlu1 %v538_v54  ;;  %536 = vadd.xlane.f32.xlu0 %v535_v55  ;;  %v1518_v4 = vpop.f32.mrb[12].mxu0  ;;  %v1520_v5 = vpop.f32.mrb[12].mxu1  ;;  %v479_v54 = vld [vmem:[%s2175_s3 + $0xd8] sm:$0xff]  ;;  %v478_v55 = vld [vmem:[%s2175_s3 + $0xd0] sm:$0xff]  ;;  %v445_v32 = vadd.f32 %v413_v15, %v361_v10 }
  0xfe   :  { %v1528_v11 = vpop.f32.mrb[13].mxu0  ;;  %v1530_v12 = vpop.f32.mrb[13].mxu1  ;;  %v550_v0 = vsel %vm516_vm1, %v1576_v47, 0.0  ;;  %v1604_v2 = vadd.f32 %v479_v54, %v447_v46  ;;  %v1606_v48 = vadd.f32 %v478_v55, %v446_v45  ;;  %v318_v19 = vadd.f32 %v1518_v4, %v1358_v20  ;;  %v476_v4 = vld [vmem:[%s2175_s3 + $0xc0] sm:$0xff]  ;;  %v466_v45 = vld [vmem:[%s2175_s3 + $0x70] sm:$0xff] }
  0xff   :  { %v1130_v16 = vpop.f32.mrb[14].mxu0  ;;  %v1538_v17 = vpop.f32.mrb[14].mxu1  ;;  %v541_v41 = vsel %vm516_vm1, %v1637_v29, 0.0  ;;  %v310_v46 = vadd.f32 %v1358_v20, %v1528_v11  ;;  %v374_v11 = vadd.f32 %v1358_v20, %v1530_v12 }
 0x100   :  { %v1544_v23 = vpop.f32.mrb[15].mxu0  ;;  %v1546_v24 = vpop.f32.mrb[15].mxu1  ;;  %v598_v18 = vsel %vm516_vm1, %v1604_v2, 0.0  ;;  %v595_v51 = vsel %vm516_vm1, %v1606_v48, 0.0  ;;  %v321_v25 = vadd.f32 %v1130_v16, %v1358_v20  ;;  %v477_v16 = vld [vmem:[%s2175_s3 + $0xc8] sm:$0xff]  ;;  %v434_v35 = vadd.f32 %v402_v27, %v318_v19  ;;  %v418_v27 = vld [vmem:[%s2174_s4 + $0xf0] sm:$0xff] }
 0x101   :  { %587 = vadd.xlane.f32.xlu1 %v586_v6  ;;  %584 = vadd.xlane.f32.xlu0 %v583_v7  ;;  %v358_v6 = vadd.f32 %v1358_v20, %v1472_v39  ;;  %v429_v7 = vadd.f32 %v397_v63, %v297_v61  ;;  %v461_v39 = vld [vmem:[%s2175_s3 + $0x48] sm:$0xff]  ;;  %v313_v54 = vadd.f32 %v1358_v20, %v1544_v23  ;;  %v416_v63 = vld [vmem:[%s2174_s4 + $0xe0] sm:$0xff] }
 0x102   :  { %v435_v40 = vadd.f32 %v403_v28, %v321_v25  ;;  %v1663_v55 = vadd.f32 %v477_v16, %v445_v32  ;;  %v401_v61 = vld [vmem:[%s2174_s4 + $0x68] sm:$0xff]  ;;  %v1677_v23 = vadd.f32 %v466_v45, %v434_v35  ;;  %v385_v19 = vadd.f32 %v1538_v17, %v1358_v20  ;;  %v419_v28 = vld [vmem:[%s2174_s4 + $0xf8] sm:$0xff] }
 0x103   :  { %v444_v26 = vadd.f32 %v412_v8, %v358_v6  ;;  %v1639_v34 = vadd.f32 %v461_v39, %v429_v7  ;;  %v433_v3 = vadd.f32 %v401_v61, %v313_v54  ;;  %v465_v6 = vld [vmem:[%s2175_s3 + $0x68] sm:$0xff]  ;;  %v464_v7 = vld [vmem:[%s2175_s3 + $0x60] sm:$0xff]  ;;  %v448_v8 = vadd.f32 %v416_v63, %v374_v11  ;;  %v483_v35 = vld [vmem:[%s2175_s3 + $0xf8] sm:$0xff] }
 0x104   :  { %v592_v12 = vsel %vm516_vm1, %v1663_v55, 0.0  ;;  %v559_v15 = vsel %vm516_vm1, %v1677_v23, 0.0  ;;  %v481_v39 = vld [vmem:[%s2175_s3 + $0xe8] sm:$0xff] }
 0x105   :  { %533 = vadd.xlane.f32.xlu1 %v532_v33  ;;  %530 = vadd.xlane.f32.xlu0 %v529_v42  ;;  %v1649_v33 = vadd.f32 %v476_v4, %v444_v26  ;;  %v467_v42 = vld [vmem:[%s2175_s3 + $0x78] sm:$0xff]  ;;  %v544_v53 = vsel %vm516_vm1, %v1639_v34, 0.0  ;;  %v1709_v25 = vadd.f32 %v465_v6, %v433_v3 }
 0x107   :  { %v556_v17 = vsel %vm516_vm1, %v1709_v25, 0.0 }
 0x109   :  { %581 = vadd.xlane.f32.xlu1 %v580_v62  ;;  %578 = vadd.xlane.f32.xlu0 %v577_v38  ;;  %v377_v62 = vadd.f32 %v1358_v20, %v1546_v24  ;;  %v1675_v38 = vadd.f32 %v467_v42, %v435_v40  ;;  %v589_v24 = vsel %vm516_vm1, %v1649_v33, 0.0  ;;  %v482_v40 = vld [vmem:[%s2175_s3 + $0xf0] sm:$0xff] }
 0x10b   :  { %v562_v14 = vsel %vm516_vm1, %v1675_v38, 0.0 }
 0x10d   :  { %551 = vadd.xlane.f32.xlu1 %v550_v0  ;;  %548 = vadd.xlane.f32.xlu0 %v547_v1  ;;  %v417_v0 = vld [vmem:[%s2174_s4 + $0xe8] sm:$0xff]  ;;  %v432_v1 = vadd.f32 %v400_v58, %v310_v46 }
 0x10e   :  { %v449_v10 = vadd.f32 %v417_v0, %v377_v62 }
 0x10f   :  { %v1711_v26 = vadd.f32 %v464_v7, %v432_v1 }
 0x110   :  { %v1719_v32 = vadd.f32 %v481_v39, %v449_v10 }
 0x111   :  { %599 = vadd.xlane.f32.xlu1 %v598_v18  ;;  %596 = vadd.xlane.f32.xlu0 %v595_v51  ;;  %v480_v18 = vld [vmem:[%s2175_s3 + $0xe0] sm:$0xff]  ;;  %v382_v51 = vadd.f32 %v1520_v5, %v1358_v20  ;;  %v451_v20 = vadd.f32 %v419_v28, %v385_v19  ;;  %v553_v16 = vsel %vm516_vm1, %v1711_v26, 0.0 }
 0x112   :  { %v1721_v5 = vadd.f32 %v480_v18, %v448_v8 }
 0x113   :  { %v450_v4 = vadd.f32 %v418_v27, %v382_v51  ;;  %v1737_v45 = vadd.f32 %v483_v35, %v451_v20 }
 0x114   :  { %v601_v42 = vsel %vm516_vm1, %v1721_v5, 0.0 }
 0x115   :  { %545 = vadd.xlane.f32.xlu1 %v544_v53  ;;  %542 = vadd.xlane.f32.xlu0 %v541_v41  ;;  %v604_v41 = vsel %vm516_vm1, %v1719_v32, 0.0  ;;  %v1739_v46 = vadd.f32 %v482_v40, %v450_v4  ;;  %v610_v53 = vsel %vm516_vm1, %v1737_v45, 0.0 }
 0x117   :  { %v607_v54 = vsel %vm516_vm1, %v1739_v46, 0.0 }
 0x119   :  { %593 = vadd.xlane.f32.xlu1 %v592_v12  ;;  %590 = vadd.xlane.f32.xlu0 %v589_v24 }
 0x11d   :  { %563 = vadd.xlane.f32.xlu1 %v562_v14  ;;  %560 = vadd.xlane.f32.xlu0 %v559_v15 }
 0x121   :  { %557 = vadd.xlane.f32.xlu1 %v556_v17  ;;  %554 = vadd.xlane.f32.xlu0 %v553_v16 }
 0x125   :  { %605 = vadd.xlane.f32.xlu1 %v604_v41  ;;  %602 = vadd.xlane.f32.xlu0 %v601_v42 }
 0x129   :  { %611 = vadd.xlane.f32.xlu1 %v610_v53  ;;  %608 = vadd.xlane.f32.xlu0 %v607_v54 }
 0x17a   :  { %v573_v58 = vpop.xlane.xlu0 %572  ;;  %v525_v61 = vpop.xlane.xlu1 %524 }
 0x17b   :  { %v632_v11 = vmul.f32 0.03125, %v573_v58  ;;  %v616_v62 = vmul.f32 0.03125, %v525_v61 }
 0x17d   :  { %v1746_v63 = vsub.f32 %v1396_v49, %v632_v11  ;;  %v1749_v0 = vsub.f32 %v1398_v50, %v616_v62 }
 0x17e   :  { %v528_v1 = vpop.xlane.xlu1 %527  ;;  %v519_v3 = vpop.xlane.xlu0 %518 }
 0x17f   :  { %v617_v12 = vmul.f32 0.03125, %v528_v1  ;;  %v614_v24 = vmul.f32 0.03125, %v519_v3  ;;  %v680_v6 = vmul.f32 %v1749_v0, %v1749_v0  ;;  %v696_v49 = vmul.f32 %v1746_v63, %v1746_v63 }
 0x181   :  { %v1754_v7 = vsub.f32 %v1412_v59, %v617_v12  ;;  %v1757_v8 = vsub.f32 %v1414_v60, %v614_v24  ;;  %v716_v10 = vsel %vm516_vm1, %v680_v6, 0.0  ;;  %v764_v27 = vsel %vm516_vm1, %v696_v49, 0.0 }
 0x182   :  { %v576_v50 = vpop.xlane.xlu1 %575  ;;  %717 = vadd.xlane.f32.xlu0 %v716_v10  ;;  %v567_v14 = vpop.xlane.xlu0 %566 }
 0x183   :  { %v633_v15 = vmul.f32 0.03125, %v576_v50  ;;  %v630_v39 = vmul.f32 0.03125, %v567_v14  ;;  %v681_v18 = vmul.f32 %v1754_v7, %v1754_v7  ;;  %v678_v59 = vmul.f32 %v1757_v8, %v1757_v8 }
 0x185   :  { %v1767_v51 = vsub.f32 %v1435_v13, %v633_v15  ;;  %v1770_v60 = vsub.f32 %v1429_v9, %v630_v39  ;;  %v719_v19 = vsel %vm516_vm1, %v681_v18, 0.0  ;;  %v710_v35 = vsel %vm516_vm1, %v678_v59, 0.0 }
 0x186   :  { %v570_v28 = vpop.xlane.xlu1 %569  ;;  %720 = vadd.xlane.f32.xlu1 %v719_v19  ;;  %765 = vadd.xlane.f32.xlu0 %v764_v27  ;;  %v522_v4 = vpop.xlane.xlu0 %521 }
 0x187   :  { %v631_v20 = vmul.f32 0.03125, %v570_v28  ;;  %v615_v17 = vmul.f32 0.03125, %v522_v4  ;;  %v697_v16 = vmul.f32 %v1767_v51, %v1767_v51  ;;  %v694_v41 = vmul.f32 %v1770_v60, %v1770_v60 }
 0x189   :  { %v1778_v13 = vsub.f32 %v1462_v30, %v631_v20  ;;  %v1781_v9 = vsub.f32 %v1464_v31, %v615_v17  ;;  %v767_v40 = vsel %vm516_vm1, %v697_v16, 0.0  ;;  %v758_v62 = vsel %vm516_vm1, %v694_v41, 0.0 }
 0x18a   :  { %v540_v42 = vpop.xlane.xlu1 %539  ;;  %768 = vadd.xlane.f32.xlu1 %v767_v40  ;;  %711 = vadd.xlane.f32.xlu0 %v710_v35  ;;  %v537_v53 = vpop.xlane.xlu0 %536 }
 0x18b   :  { %v621_v54 = vmul.f32 0.03125, %v540_v42  ;;  %v620_v58 = vmul.f32 0.03125, %v537_v53  ;;  %v679_v61 = vmul.f32 %v1781_v9, %v1781_v9  ;;  %v695_v30 = vmul.f32 %v1778_v13, %v1778_v13 }
 0x18d   :  { %v1791_v31 = vsub.f32 %v1466_v36, %v621_v54  ;;  %v1794_v11 = vsub.f32 %v1468_v37, %v620_v58  ;;  %v713_v1 = vsel %vm516_vm1, %v679_v61, 0.0  ;;  %v761_v49 = vsel %vm516_vm1, %v695_v30, 0.0 }
 0x18e   :  { %v588_v3 = vpop.xlane.xlu1 %587  ;;  %759 = vadd.xlane.f32.xlu0 %v758_v62  ;;  %714 = vadd.xlane.f32.xlu1 %v713_v1  ;;  %v585_v12 = vpop.xlane.xlu0 %584 }
 0x18f   :  { %v637_v24 = vmul.f32 0.03125, %v588_v3  ;;  %v636_v6 = vmul.f32 0.03125, %v585_v12  ;;  %v684_v10 = vmul.f32 %v1794_v11, %v1794_v11  ;;  %v685_v14 = vmul.f32 %v1791_v31, %v1791_v31 }
 0x191   :  { %v1802_v36 = vsub.f32 %v1500_v56, %v637_v24  ;;  %v1805_v37 = vsub.f32 %v1502_v57, %v636_v6  ;;  %v728_v50 = vsel %vm516_vm1, %v684_v10, 0.0  ;;  %v731_v28 = vsel %vm516_vm1, %v685_v14, 0.0 }
 0x192   :  { %v534_v15 = vpop.xlane.xlu1 %533  ;;  %762 = vadd.xlane.f32.xlu1 %v761_v49  ;;  %729 = vadd.xlane.f32.xlu0 %v728_v50  ;;  %v531_v39 = vpop.xlane.xlu0 %530 }
 0x193   :  { %v619_v18 = vmul.f32 0.03125, %v534_v15  ;;  %v618_v59 = vmul.f32 0.03125, %v531_v39  ;;  %v700_v19 = vmul.f32 %v1805_v37, %v1805_v37  ;;  %v701_v56 = vmul.f32 %v1802_v36, %v1802_v36 }
 0x195   :  { %v1815_v57 = vsub.f32 %v1540_v21, %v619_v18  ;;  %v1818_v27 = vsub.f32 %v1542_v22, %v618_v59  ;;  %v776_v4 = vsel %vm516_vm1, %v700_v19, 0.0  ;;  %v779_v41 = vsel %vm516_vm1, %v701_v56, 0.0 }
 0x196   :  { %v582_v20 = vpop.xlane.xlu1 %581  ;;  %732 = vadd.xlane.f32.xlu1 %v731_v28  ;;  %777 = vadd.xlane.f32.xlu0 %v776_v4  ;;  %v579_v17 = vpop.xlane.xlu0 %578 }
 0x197   :  { %v635_v16 = vmul.f32 0.03125, %v582_v20  ;;  %v634_v35 = vmul.f32 0.03125, %v579_v17  ;;  %v682_v40 = vmul.f32 %v1818_v27, %v1818_v27  ;;  %v683_v53 = vmul.f32 %v1815_v57, %v1815_v57 }
 0x199   :  { %v1826_v21 = vsub.f32 %v1572_v44, %v635_v16  ;;  %v1829_v22 = vsub.f32 %v1574_v43, %v634_v35  ;;  %v722_v42 = vsel %vm516_vm1, %v682_v40, 0.0  ;;  %v725_v3 = vsel %vm516_vm1, %v683_v53, 0.0 }
 0x19a   :  { %v552_v54 = vpop.xlane.xlu1 %551  ;;  %780 = vadd.xlane.f32.xlu1 %v779_v41  ;;  %723 = vadd.xlane.f32.xlu0 %v722_v42  ;;  %v549_v58 = vpop.xlane.xlu0 %548 }
 0x19b   :  { %v625_v61 = vmul.f32 0.03125, %v552_v54  ;;  %v624_v30 = vmul.f32 0.03125, %v549_v58  ;;  %v698_v62 = vmul.f32 %v1829_v22, %v1829_v22  ;;  %v699_v44 = vmul.f32 %v1826_v21, %v1826_v21 }
 0x19d   :  { %v1839_v43 = vsub.f32 %v1576_v47, %v625_v61  ;;  %v1842_v1 = vsub.f32 %v1578_v52, %v624_v30  ;;  %v770_v12 = vsel %vm516_vm1, %v698_v62, 0.0  ;;  %v773_v14 = vsel %vm516_vm1, %v699_v44, 0.0 }
 0x19e   :  { %v600_v24 = vpop.xlane.xlu1 %599  ;;  %726 = vadd.xlane.f32.xlu1 %v725_v3  ;;  %771 = vadd.xlane.f32.xlu0 %v770_v12  ;;  %v597_v6 = vpop.xlane.xlu0 %596 }
 0x19f   :  { %v641_v10 = vmul.f32 0.03125, %v600_v24  ;;  %v640_v49 = vmul.f32 0.03125, %v597_v6  ;;  %v688_v50 = vmul.f32 %v1842_v1, %v1842_v1  ;;  %v689_v39 = vmul.f32 %v1839_v43, %v1839_v43 }
 0x1a1   :  { %v1850_v47 = vsub.f32 %v1604_v2, %v641_v10  ;;  %v1853_v52 = vsub.f32 %v1606_v48, %v640_v49  ;;  %v740_v15 = vsel %vm516_vm1, %v688_v50, 0.0  ;;  %v743_v20 = vsel %vm516_vm1, %v689_v39, 0.0 }
 0x1a2   :  { %v546_v18 = vpop.xlane.xlu1 %545  ;;  %774 = vadd.xlane.f32.xlu1 %v773_v14  ;;  %741 = vadd.xlane.f32.xlu0 %v740_v15  ;;  %v543_v59 = vpop.xlane.xlu0 %542 }
 0x1a3   :  { %v623_v19 = vmul.f32 0.03125, %v546_v18  ;;  %v622_v56 = vmul.f32 0.03125, %v543_v59  ;;  %v704_v28 = vmul.f32 %v1853_v52, %v1853_v52  ;;  %v705_v2 = vmul.f32 %v1850_v47, %v1850_v47 }
 0x1a5   :  { %v1863_v48 = vsub.f32 %v1639_v34, %v623_v19  ;;  %v1866_v4 = vsub.f32 %v1637_v29, %v622_v56  ;;  %v788_v17 = vsel %vm516_vm1, %v704_v28, 0.0  ;;  %v791_v53 = vsel %vm516_vm1, %v705_v2, 0.0 }
 0x1a6   :  { %v594_v16 = vpop.xlane.xlu1 %593  ;;  %744 = vadd.xlane.f32.xlu1 %v743_v20  ;;  %789 = vadd.xlane.f32.xlu0 %v788_v17  ;;  %v591_v35 = vpop.xlane.xlu0 %590 }
 0x1a7   :  { %v639_v40 = vmul.f32 0.03125, %v594_v16  ;;  %v638_v41 = vmul.f32 0.03125, %v591_v35  ;;  %v686_v42 = vmul.f32 %v1866_v4, %v1866_v4  ;;  %v687_v58 = vmul.f32 %v1863_v48, %v1863_v48 }
 0x1a9   :  { %v1874_v34 = vsub.f32 %v1663_v55, %v639_v40  ;;  %v1877_v29 = vsub.f32 %v1649_v33, %v638_v41  ;;  %v734_v54 = vsel %vm516_vm1, %v686_v42, 0.0  ;;  %v737_v24 = vsel %vm516_vm1, %v687_v58, 0.0 }
 0x1aa   :  { %v564_v61 = vpop.xlane.xlu1 %563  ;;  %792 = vadd.xlane.f32.xlu1 %v791_v53  ;;  %735 = vadd.xlane.f32.xlu0 %v734_v54  ;;  %v561_v30 = vpop.xlane.xlu0 %560 }
 0x1ab   :  { %v629_v62 = vmul.f32 0.03125, %v564_v61  ;;  %v628_v44 = vmul.f32 0.03125, %v561_v30  ;;  %v702_v3 = vmul.f32 %v1877_v29, %v1877_v29  ;;  %v703_v55 = vmul.f32 %v1874_v34, %v1874_v34 }
 0x1ad   :  { %v1887_v33 = vsub.f32 %v1675_v38, %v629_v62  ;;  %v1890_v12 = vsub.f32 %v1677_v23, %v628_v44  ;;  %v782_v6 = vsel %vm516_vm1, %v702_v3, 0.0  ;;  %v785_v39 = vsel %vm516_vm1, %v703_v55, 0.0 }
 0x1ae   :  { %v558_v10 = vpop.xlane.xlu1 %557  ;;  %738 = vadd.xlane.f32.xlu1 %v737_v24  ;;  %783 = vadd.xlane.f32.xlu0 %v782_v6  ;;  %v555_v49 = vpop.xlane.xlu0 %554 }
 0x1af   :  { %v627_v50 = vmul.f32 0.03125, %v558_v10  ;;  %v626_v14 = vmul.f32 0.03125, %v555_v49  ;;  %v692_v15 = vmul.f32 %v1890_v12, %v1890_v12  ;;  %v693_v59 = vmul.f32 %v1887_v33, %v1887_v33 }
 0x1b1   :  { %v1898_v38 = vsub.f32 %v1709_v25, %v627_v50  ;;  %v1901_v23 = vsub.f32 %v1711_v26, %v626_v14  ;;  %v752_v18 = vsel %vm516_vm1, %v692_v15, 0.0  ;;  %v755_v16 = vsel %vm516_vm1, %v693_v59, 0.0 }
 0x1b2   :  { %v606_v19 = vpop.xlane.xlu1 %605  ;;  %786 = vadd.xlane.f32.xlu1 %v785_v39  ;;  %753 = vadd.xlane.f32.xlu0 %v752_v18  ;;  %v603_v56 = vpop.xlane.xlu0 %602 }
 0x1b3   :  { %v643_v28 = vmul.f32 0.03125, %v606_v19  ;;  %v642_v2 = vmul.f32 0.03125, %v603_v56  ;;  %v690_v20 = vmul.f32 %v1901_v23, %v1901_v23  ;;  %v691_v25 = vmul.f32 %v1898_v38, %v1898_v38 }
 0x1b5   :  { %v1911_v26 = vsub.f32 %v1719_v32, %v643_v28  ;;  %v1914_v17 = vsub.f32 %v1721_v5, %v642_v2  ;;  %v746_v35 = vsel %vm516_vm1, %v690_v20, 0.0  ;;  %v749_v58 = vsel %vm516_vm1, %v691_v25, 0.0 }
 0x1b6   :  { %v612_v40 = vpop.xlane.xlu1 %611  ;;  %756 = vadd.xlane.f32.xlu1 %v755_v16  ;;  %747 = vadd.xlane.f32.xlu0 %v746_v35  ;;  %v609_v41 = vpop.xlane.xlu0 %608 }
 0x1b7   :  { %v645_v42 = vmul.f32 0.03125, %v612_v40  ;;  %v644_v53 = vmul.f32 0.03125, %v609_v41  ;;  %v706_v54 = vmul.f32 %v1914_v17, %v1914_v17  ;;  %v707_v30 = vmul.f32 %v1911_v26, %v1911_v26  ;;  %v1940_v41 = vld [vmem:[%s2176_s5] ss:$0 sm:$0xff] }
 0x1b9   :  { %v1922_v32 = vsub.f32 %v1737_v45, %v645_v42  ;;  %v1925_v5 = vsub.f32 %v1739_v46, %v644_v53  ;;  %v794_v61 = vsel %vm516_vm1, %v706_v54, 0.0  ;;  %v797_v44 = vsel %vm516_vm1, %v707_v30, 0.0  ;;  %v1946_v30 = vld [vmem:[%s2177_s6] ss:$0 sm:$0xff] }
 0x1ba   :  { %750 = vadd.xlane.f32.xlu1 %v749_v58  ;;  %795 = vadd.xlane.f32.xlu0 %v794_v61 }
 0x1bb   :  { %v708_v62 = vmul.f32 %v1925_v5, %v1925_v5  ;;  %v709_v45 = vmul.f32 %v1922_v32, %v1922_v32 }
 0x1bd   :  { %v800_v3 = vsel %vm516_vm1, %v708_v62, 0.0  ;;  %v803_v46 = vsel %vm516_vm1, %v709_v45, 0.0 }
 0x1be   :  { %798 = vadd.xlane.f32.xlu1 %v797_v44  ;;  %801 = vadd.xlane.f32.xlu0 %v800_v3 }
 0x1c2   :  { %804 = vadd.xlane.f32.xlu1 %v803_v46 }
 0x20f   :  { %v718_v55 = vpop.xlane.xlu0 %717 }
 0x210   :  { %v808_v24 = vmul.f32 0.03125, %v718_v55 }
 0x212   :  { %v840_v6 = vadd.f32 1e-12, %v808_v24 }
 0x213   :  { %v721_v10 = vpop.xlane.xlu1 %720  ;;  %v766_v49 = vpop.xlane.xlu0 %765 }
 0x214   :  { %1175 = vrsqrt.f32 %v840_v6  ;;  %v809_v50 = vmul.f32 0.03125, %v721_v10  ;;  %v824_v14 = vmul.f32 0.03125, %v766_v49 }
 0x216   :  { %v841_v15 = vadd.f32 1e-12, %v809_v50  ;;  %v856_v39 = vadd.f32 1e-12, %v824_v14 }
 0x217   :  { %v769_v18 = vpop.xlane.xlu1 %768  ;;  %v712_v59 = vpop.xlane.xlu0 %711 }
 0x218   :  { %1177 = vrsqrt.f32 %v841_v15  ;;  %v825_v19 = vmul.f32 0.03125, %v769_v18  ;;  %v806_v56 = vmul.f32 0.03125, %v712_v59 }
 0x219   :  { %1179 = vrsqrt.f32 %v856_v39 }
 0x21a   :  { %v857_v28 = vadd.f32 1e-12, %v825_v19  ;;  %v838_v2 = vadd.f32 1e-12, %v806_v56 }
 0x21b   :  { %v715_v20 = vpop.xlane.xlu1 %714  ;;  %v760_v25 = vpop.xlane.xlu0 %759 }
 0x21c   :  { %1181 = vrsqrt.f32 %v857_v28  ;;  %v807_v16 = vmul.f32 0.03125, %v715_v20  ;;  %v822_v35 = vmul.f32 0.03125, %v760_v25 }
 0x21d   :  { %1183 = vrsqrt.f32 %v838_v2 }
 0x21e   :  { %v1176_v40 = vpop.eup %1175  ;;  %v839_v42 = vadd.f32 1e-12, %v807_v16  ;;  %v854_v53 = vadd.f32 1e-12, %v822_v35 }
 0x21f   :  { %v904_v54 = vmul.f32 %v1176_v40, %v1749_v0  ;;  %v763_v58 = vpop.xlane.xlu1 %762  ;;  %v730_v61 = vpop.xlane.xlu0 %729 }
 0x220   :  { %1185 = vrsqrt.f32 %v839_v42  ;;  %v823_v62 = vmul.f32 0.03125, %v763_v58  ;;  %v812_v44 = vmul.f32 0.03125, %v730_v61 }
 0x221   :  { %v943_v3 = vmul.f32 %v1940_v41, %v904_v54  ;;  %1187 = vrsqrt.f32 %v854_v53 }
 0x222   :  { %v1178_v45 = vpop.eup %1177  ;;  %v855_v46 = vadd.f32 1e-12, %v823_v62  ;;  %v844_v55 = vadd.f32 1e-12, %v812_v44 }
 0x223   :  { %v1180_v24 = vpop.eup %1179  ;;  %v982_v6 = vadd.f32 %v1946_v30, %v943_v3  ;;  %v905_v0 = vmul.f32 %v1178_v45, %v1754_v7  ;;  %v733_v10 = vpop.xlane.xlu1 %732 }
 0x224   :  { %v778_v49 = vpop.xlane.xlu0 %777  ;;  %v920_v50 = vmul.f32 %v1180_v24, %v1746_v63  ;;  %1189 = vrsqrt.f32 %v855_v46  ;;  %v813_v14 = vmul.f32 0.03125, %v733_v10 }
 0x225   :  { %v828_v15 = vmul.f32 0.03125, %v778_v49  ;;  %1014 = vst.msk [vmem:[%s2178_s7 + $0x10] sm:$0xff] %vm516_vm1, %v982_v6  ;;  %v944_v39 = vmul.f32 %v1940_v41, %v905_v0  ;;  %1191 = vrsqrt.f32 %v844_v55 }
 0x226   :  { %v1182_v18 = vpop.eup %1181  ;;  %v959_v59 = vmul.f32 %v1940_v41, %v920_v50  ;;  %v845_v19 = vadd.f32 1e-12, %v813_v14 }
 0x227   :  { %v860_v7 = vadd.f32 1e-12, %v828_v15  ;;  %v1184_v56 = vpop.eup %1183  ;;  %v983_v28 = vadd.f32 %v1946_v30, %v944_v39  ;;  %v921_v63 = vmul.f32 %v1182_v18, %v1767_v51  ;;  %v781_v2 = vpop.xlane.xlu1 %780 }
 0x228   :  { %v724_v20 = vpop.xlane.xlu0 %723  ;;  %v998_v25 = vadd.f32 %v1946_v30, %v959_v59  ;;  %v902_v16 = vmul.f32 %v1184_v56, %v1757_v8  ;;  %1193 = vrsqrt.f32 %v845_v19  ;;  %v829_v35 = vmul.f32 0.03125, %v781_v2 }
 0x229   :  { %1015 = vst.msk [vmem:[%s2178_s7 + $0x18] sm:$0xff] %vm516_vm1, %v983_v28  ;;  %v960_v40 = vmul.f32 %v1940_v41, %v921_v63  ;;  %1195 = vrsqrt.f32 %v860_v7  ;;  %v810_v42 = vmul.f32 0.03125, %v724_v20 }
 0x22a   :  { %v1186_v53 = vpop.eup %1185  ;;  %1030 = vst.msk [vmem:[%s2178_s7 + $0x90] sm:$0xff] %vm516_vm1, %v998_v25  ;;  %v941_v51 = vmul.f32 %v1940_v41, %v902_v16  ;;  %v861_v8 = vadd.f32 1e-12, %v829_v35 }
 0x22b   :  { %v1188_v54 = vpop.eup %1187  ;;  %v999_v58 = vadd.f32 %v1946_v30, %v960_v40  ;;  %v903_v61 = vmul.f32 %v1186_v53, %v1781_v9  ;;  %v842_v62 = vadd.f32 1e-12, %v810_v42  ;;  %v727_v44 = vpop.xlane.xlu1 %726 }
 0x22c   :  { %v772_v3 = vpop.xlane.xlu0 %771  ;;  %v980_v45 = vadd.f32 %v1946_v30, %v941_v51  ;;  %v918_v46 = vmul.f32 %v1188_v54, %v1770_v60  ;;  %1197 = vrsqrt.f32 %v861_v8  ;;  %v811_v55 = vmul.f32 0.03125, %v727_v44 }
 0x22d   :  { %1031 = vst.msk [vmem:[%s2178_s7 + $0x98] sm:$0xff] %vm516_vm1, %v999_v58  ;;  %v942_v24 = vmul.f32 %v1940_v41, %v903_v61  ;;  %1199 = vrsqrt.f32 %v842_v62  ;;  %v826_v6 = vmul.f32 0.03125, %v772_v3 }
 0x22e   :  { %v1190_v0 = vpop.eup %1189  ;;  %1012 = vst.msk [vmem:[%s2178_s7] sm:$0xff] %vm516_vm1, %v980_v45  ;;  %v957_v9 = vmul.f32 %v1940_v41, %v918_v46  ;;  %v843_v60 = vadd.f32 1e-12, %v811_v55 }
 0x22f   :  { %v1192_v10 = vpop.eup %1191  ;;  %v981_v49 = vadd.f32 %v1946_v30, %v942_v24  ;;  %v919_v50 = vmul.f32 %v1190_v0, %v1778_v13  ;;  %v858_v14 = vadd.f32 1e-12, %v826_v6  ;;  %v775_v15 = vpop.xlane.xlu1 %774 }
 0x230   :  { %v742_v39 = vpop.xlane.xlu0 %741  ;;  %v996_v18 = vadd.f32 %v1946_v30, %v957_v9  ;;  %v908_v59 = vmul.f32 %v1192_v10, %v1794_v11  ;;  %1201 = vrsqrt.f32 %v843_v60  ;;  %v827_v19 = vmul.f32 0.03125, %v775_v15 }
 0x231   :  { %1013 = vst.msk [vmem:[%s2178_s7 + $0x8] sm:$0xff] %vm516_vm1, %v981_v49  ;;  %v958_v7 = vmul.f32 %v1940_v41, %v919_v50  ;;  %1203 = vrsqrt.f32 %v858_v14  ;;  %v816_v56 = vmul.f32 0.03125, %v742_v39 }
 0x232   :  { %v1194_v28 = vpop.eup %1193  ;;  %1028 = vst.msk [vmem:[%s2178_s7 + $0x80] sm:$0xff] %vm516_vm1, %v996_v18  ;;  %v947_v13 = vmul.f32 %v1940_v41, %v908_v59  ;;  %v859_v11 = vadd.f32 1e-12, %v827_v19 }
 0x233   :  { %v1196_v63 = vpop.eup %1195  ;;  %v997_v2 = vadd.f32 %v1946_v30, %v958_v7  ;;  %v909_v20 = vmul.f32 %v1194_v28, %v1791_v31  ;;  %v848_v25 = vadd.f32 1e-12, %v816_v56  ;;  %v745_v16 = vpop.xlane.xlu1 %744 }
 0x234   :  { %v790_v35 = vpop.xlane.xlu0 %789  ;;  %v986_v40 = vadd.f32 %v1946_v30, %v947_v13  ;;  %v924_v42 = vmul.f32 %v1196_v63, %v1805_v37  ;;  %1205 = vrsqrt.f32 %v859_v11  ;;  %v817_v53 = vmul.f32 0.03125, %v745_v16 }
 0x235   :  { %1029 = vst.msk [vmem:[%s2178_s7 + $0x88] sm:$0xff] %vm516_vm1, %v997_v2  ;;  %v948_v51 = vmul.f32 %v1940_v41, %v909_v20  ;;  %1207 = vrsqrt.f32 %v848_v25  ;;  %v832_v8 = vmul.f32 0.03125, %v790_v35 }
 0x236   :  { %v1198_v54 = vpop.eup %1197  ;;  %1018 = vst.msk [vmem:[%s2178_s7 + $0x30] sm:$0xff] %vm516_vm1, %v986_v40  ;;  %v963_v31 = vmul.f32 %v1940_v41, %v924_v42  ;;  %v849_v37 = vadd.f32 1e-12, %v817_v53 }
 0x237   :  { %v1200_v58 = vpop.eup %1199  ;;  %v987_v61 = vadd.f32 %v1946_v30, %v948_v51  ;;  %v925_v62 = vmul.f32 %v1198_v54, %v1802_v36  ;;  %v864_v44 = vadd.f32 1e-12, %v832_v8  ;;  %v793_v3 = vpop.xlane.xlu1 %792 }
 0x238   :  { %v736_v45 = vpop.xlane.xlu0 %735  ;;  %v1002_v46 = vadd.f32 %v1946_v30, %v963_v31  ;;  %v906_v55 = vmul.f32 %v1200_v58, %v1818_v27  ;;  %1209 = vrsqrt.f32 %v849_v37  ;;  %v833_v24 = vmul.f32 0.03125, %v793_v3 }
 0x239   :  { %1019 = vst.msk [vmem:[%s2178_s7 + $0x38] sm:$0xff] %vm516_vm1, %v987_v61  ;;  %v964_v6 = vmul.f32 %v1940_v41, %v925_v62  ;;  %1211 = vrsqrt.f32 %v864_v44  ;;  %v814_v0 = vmul.f32 0.03125, %v736_v45 }
 0x23a   :  { %v1202_v9 = vpop.eup %1201  ;;  %1034 = vst.msk [vmem:[%s2178_s7 + $0xb0] sm:$0xff] %vm516_vm1, %v1002_v46  ;;  %v945_v36 = vmul.f32 %v1940_v41, %v906_v55  ;;  %v865_v27 = vadd.f32 1e-12, %v833_v24 }
 0x23b   :  { %v1204_v60 = vpop.eup %1203  ;;  %v1003_v10 = vadd.f32 %v1946_v30, %v964_v6  ;;  %v907_v49 = vmul.f32 %v1202_v9, %v1815_v57  ;;  %v846_v50 = vadd.f32 1e-12, %v814_v0  ;;  %v739_v14 = vpop.xlane.xlu1 %738 }
 0x23c   :  { %v784_v15 = vpop.xlane.xlu0 %783  ;;  %v984_v39 = vadd.f32 %v1946_v30, %v945_v36  ;;  %v922_v18 = vmul.f32 %v1204_v60, %v1829_v22  ;;  %1213 = vrsqrt.f32 %v865_v27  ;;  %v815_v59 = vmul.f32 0.03125, %v739_v14 }
 0x23d   :  { %1035 = vst.msk [vmem:[%s2178_s7 + $0xb8] sm:$0xff] %vm516_vm1, %v1003_v10  ;;  %v946_v19 = vmul.f32 %v1940_v41, %v907_v49  ;;  %1215 = vrsqrt.f32 %v846_v50  ;;  %v830_v7 = vmul.f32 0.03125, %v784_v15 }
 0x23e   :  { %v1206_v56 = vpop.eup %1205  ;;  %1016 = vst.msk [vmem:[%s2178_s7 + $0x20] sm:$0xff] %vm516_vm1, %v984_v39  ;;  %v961_v57 = vmul.f32 %v1940_v41, %v922_v18  ;;  %v847_v22 = vadd.f32 1e-12, %v815_v59 }
 0x23f   :  { %v1208_v28 = vpop.eup %1207  ;;  %v985_v13 = vadd.f32 %v1946_v30, %v946_v19  ;;  %v923_v11 = vmul.f32 %v1206_v56, %v1826_v21  ;;  %v862_v63 = vadd.f32 1e-12, %v830_v7  ;;  %v787_v2 = vpop.xlane.xlu1 %786 }
 0x240   :  { %v754_v20 = vpop.xlane.xlu0 %753  ;;  %v1000_v25 = vadd.f32 %v1946_v30, %v961_v57  ;;  %v912_v16 = vmul.f32 %v1208_v28, %v1842_v1  ;;  %1217 = vrsqrt.f32 %v847_v22  ;;  %v831_v35 = vmul.f32 0.03125, %v787_v2 }
 0x241   :  { %1017 = vst.msk [vmem:[%s2178_s7 + $0x28] sm:$0xff] %vm516_vm1, %v985_v13  ;;  %v962_v40 = vmul.f32 %v1940_v41, %v923_v11  ;;  %1219 = vrsqrt.f32 %v862_v63  ;;  %v820_v42 = vmul.f32 0.03125, %v754_v20 }
 0x242   :  { %v1210_v53 = vpop.eup %1209  ;;  %1032 = vst.msk [vmem:[%s2178_s7 + $0xa0] sm:$0xff] %vm516_vm1, %v1000_v25  ;;  %v951_v21 = vmul.f32 %v1940_v41, %v912_v16  ;;  %v863_v1 = vadd.f32 1e-12, %v831_v35 }
 0x243   :  { %v1212_v51 = vpop.eup %1211  ;;  %v1001_v8 = vadd.f32 %v1946_v30, %v962_v40  ;;  %v913_v54 = vmul.f32 %v1210_v53, %v1839_v43  ;;  %v852_v31 = vadd.f32 1e-12, %v820_v42  ;;  %v757_v37 = vpop.xlane.xlu1 %756 }
 0x244   :  { %v748_v58 = vpop.xlane.xlu0 %747  ;;  %v990_v61 = vadd.f32 %v1946_v30, %v951_v21  ;;  %v928_v62 = vmul.f32 %v1212_v51, %v1853_v52  ;;  %1221 = vrsqrt.f32 %v863_v1  ;;  %v821_v44 = vmul.f32 0.03125, %v757_v37 }
 0x245   :  { %1033 = vst.msk [vmem:[%s2178_s7 + $0xa8] sm:$0xff] %vm516_vm1, %v1001_v8  ;;  %v952_v3 = vmul.f32 %v1940_v41, %v913_v54  ;;  %1223 = vrsqrt.f32 %v852_v31  ;;  %v818_v45 = vmul.f32 0.03125, %v748_v58 }
 0x246   :  { %v1214_v46 = vpop.eup %1213  ;;  %1022 = vst.msk [vmem:[%s2178_s7 + $0x50] sm:$0xff] %vm516_vm1, %v990_v61  ;;  %v967_v43 = vmul.f32 %v1940_v41, %v928_v62  ;;  %v853_v52 = vadd.f32 1e-12, %v821_v44 }
 0x247   :  { %v1216_v55 = vpop.eup %1215  ;;  %v991_v24 = vadd.f32 %v1946_v30, %v952_v3  ;;  %v929_v6 = vmul.f32 %v1214_v46, %v1850_v47  ;;  %v850_v0 = vadd.f32 1e-12, %v818_v45  ;;  %v751_v9 = vpop.xlane.xlu1 %750 }
 0x248   :  { %v796_v36 = vpop.xlane.xlu0 %795  ;;  %v1006_v27 = vadd.f32 %v1946_v30, %v967_v43  ;;  %v910_v60 = vmul.f32 %v1216_v55, %v1866_v4  ;;  %1225 = vrsqrt.f32 %v853_v52  ;;  %v819_v10 = vmul.f32 0.03125, %v751_v9 }
 0x249   :  { %1023 = vst.msk [vmem:[%s2178_s7 + $0x58] sm:$0xff] %vm516_vm1, %v991_v24  ;;  %v968_v49 = vmul.f32 %v1940_v41, %v929_v6  ;;  %1227 = vrsqrt.f32 %v850_v0  ;;  %v834_v50 = vmul.f32 0.03125, %v796_v36 }
 0x24a   :  { %v1218_v14 = vpop.eup %1217  ;;  %1038 = vst.msk [vmem:[%s2178_s7 + $0xd0] sm:$0xff] %vm516_vm1, %v1006_v27  ;;  %v949_v47 = vmul.f32 %v1940_v41, %v910_v60  ;;  %v851_v4 = vadd.f32 1e-12, %v819_v10 }
 0x24b   :  { %v1220_v15 = vpop.eup %1219  ;;  %v1007_v39 = vadd.f32 %v1946_v30, %v968_v49  ;;  %v911_v18 = vmul.f32 %v1218_v14, %v1863_v48  ;;  %v866_v59 = vadd.f32 1e-12, %v834_v50  ;;  %v799_v19 = vpop.xlane.xlu1 %798 }
 0x24c   :  { %v802_v7 = vpop.xlane.xlu0 %801  ;;  %v988_v56 = vadd.f32 %v1946_v30, %v949_v47  ;;  %v926_v57 = vmul.f32 %v1220_v15, %v1877_v29  ;;  %1229 = vrsqrt.f32 %v851_v4  ;;  %v835_v22 = vmul.f32 0.03125, %v799_v19 }
 0x24d   :  { %1039 = vst.msk [vmem:[%s2178_s7 + $0xd8] sm:$0xff] %vm516_vm1, %v1007_v39  ;;  %v950_v28 = vmul.f32 %v1940_v41, %v911_v18  ;;  %1231 = vrsqrt.f32 %v866_v59  ;;  %v836_v13 = vmul.f32 0.03125, %v802_v7 }
 0x24e   :  { %v1222_v11 = vpop.eup %1221  ;;  %1020 = vst.msk [vmem:[%s2178_s7 + $0x40] sm:$0xff] %vm516_vm1, %v988_v56  ;;  %v965_v48 = vmul.f32 %v1940_v41, %v926_v57  ;;  %v867_v29 = vadd.f32 1e-12, %v835_v22 }
 0x24f   :  { %v1224_v63 = vpop.eup %1223  ;;  %v989_v2 = vadd.f32 %v1946_v30, %v950_v28  ;;  %v927_v20 = vmul.f32 %v1222_v11, %v1874_v34  ;;  %v868_v25 = vadd.f32 1e-12, %v836_v13  ;;  %v805_v16 = vpop.xlane.xlu1 %804 }
 0x250   :  { %v1004_v35 = vadd.f32 %v1946_v30, %v965_v48  ;;  %v916_v40 = vmul.f32 %v1224_v63, %v1890_v12  ;;  %1233 = vrsqrt.f32 %v867_v29  ;;  %v837_v42 = vmul.f32 0.03125, %v805_v16 }
 0x251   :  { %1021 = vst.msk [vmem:[%s2178_s7 + $0x48] sm:$0xff] %vm516_vm1, %v989_v2  ;;  %v966_v53 = vmul.f32 %v1940_v41, %v927_v20  ;;  %1235 = vrsqrt.f32 %v868_v25 }
 0x252   :  { %v1226_v21 = vpop.eup %1225  ;;  %1036 = vst.msk [vmem:[%s2178_s7 + $0xc0] sm:$0xff] %vm516_vm1, %v1004_v35  ;;  %v955_v34 = vmul.f32 %v1940_v41, %v916_v40  ;;  %v869_v1 = vadd.f32 1e-12, %v837_v42 }
 0x253   :  { %v1228_v12 = vpop.eup %1227  ;;  %v1005_v51 = vadd.f32 %v1946_v30, %v966_v53  ;;  %v917_v8 = vmul.f32 %v1226_v21, %v1887_v33 }
 0x254   :  { %v994_v54 = vadd.f32 %v1946_v30, %v955_v34  ;;  %v914_v31 = vmul.f32 %v1228_v12, %v1901_v23  ;;  %1237 = vrsqrt.f32 %v869_v1 }
 0x255   :  { %1037 = vst.msk [vmem:[%s2178_s7 + $0xc8] sm:$0xff] %vm516_vm1, %v1005_v51  ;;  %v956_v37 = vmul.f32 %v1940_v41, %v917_v8 }
 0x256   :  { %v1230_v58 = vpop.eup %1229  ;;  %1026 = vst.msk [vmem:[%s2178_s7 + $0x70] sm:$0xff] %vm516_vm1, %v994_v54  ;;  %v953_v33 = vmul.f32 %v1940_v41, %v914_v31 }
 0x257   :  { %v1232_v61 = vpop.eup %1231  ;;  %v995_v62 = vadd.f32 %v1946_v30, %v956_v37  ;;  %v915_v23 = vmul.f32 %v1230_v58, %v1898_v38 }
 0x258   :  { %v992_v44 = vadd.f32 %v1946_v30, %v953_v33  ;;  %v930_v3 = vmul.f32 %v1232_v61, %v1914_v17 }
 0x259   :  { %1027 = vst.msk [vmem:[%s2178_s7 + $0x78] sm:$0xff] %vm516_vm1, %v995_v62  ;;  %v954_v45 = vmul.f32 %v1940_v41, %v915_v23 }
 0x25a   :  { %v1234_v46 = vpop.eup %1233  ;;  %1024 = vst.msk [vmem:[%s2178_s7 + $0x60] sm:$0xff] %vm516_vm1, %v992_v44  ;;  %v969_v43 = vmul.f32 %v1940_v41, %v930_v3 }
 0x25b   :  { %v1236_v38 = vpop.eup %1235  ;;  %v993_v52 = vadd.f32 %v1946_v30, %v954_v45  ;;  %v931_v17 = vmul.f32 %v1234_v46, %v1911_v26 }
 0x25c   :  { %v1008_v55 = vadd.f32 %v1946_v30, %v969_v43  ;;  %v932_v24 = vmul.f32 %v1236_v38, %v1925_v5 }
 0x25d   :  { %1025 = vst.msk [vmem:[%s2178_s7 + $0x68] sm:$0xff] %vm516_vm1, %v993_v52  ;;  %v970_v6 = vmul.f32 %v1940_v41, %v931_v17 }
 0x25e   :  { %v1238_v0 = vpop.eup %1237  ;;  %1040 = vst.msk [vmem:[%s2178_s7 + $0xe0] sm:$0xff] %vm516_vm1, %v1008_v55  ;;  %v971_v9 = vmul.f32 %v1940_v41, %v932_v24 }
 0x25f   :  { %v1009_v26 = vadd.f32 %v1946_v30, %v970_v6  ;;  %v933_v36 = vmul.f32 %v1238_v0, %v1922_v32 }
 0x260   :  { %v1010_v5 = vadd.f32 %v1946_v30, %v971_v9 }
 0x261   :  { %1041 = vst.msk [vmem:[%s2178_s7 + $0xe8] sm:$0xff] %vm516_vm1, %v1009_v26  ;;  %v972_v27 = vmul.f32 %v1940_v41, %v933_v36 }
 0x262   :  { %1042 = vst.msk [vmem:[%s2178_s7 + $0xf0] sm:$0xff] %vm516_vm1, %v1010_v5 }
 0x263   :  { %v1011_v60 = vadd.f32 %v1946_v30, %v972_v27 }
 0x265   :  { %1043 = vst.msk [vmem:[%s2178_s7 + $0xf8] sm:$0xff] %vm516_vm1, %v1011_v60 }

</bundles_post_ra>
